<compile_context>
chip_gen: v5e
topology: v5e:2x2
jax: 0.10.0
libtpu: 0.0.40
codegen_flags: <defaults>
</compile_context>

<pallas_src>
import functools

import jax
import jax.numpy as jnp
from jax.experimental import pallas as pl
from jax.experimental.pallas import tpu as pltpu


def _rec_block_kernel(x_ref,
                      w1_ref, b1_ref,
                      w2_ref, b2_ref,
                      w3_ref, b3_ref,
                      w4_ref, b4_ref,
                      out_ref):
    """One row-tile of the `to_out` MLP (D -> D/2 -> D/4 -> D/2 -> D).

    x / w* arrive in the compute dtype (bf16 by default): the MXU runs native
    bf16 matmuls with f32 accumulation; bias + ReLU are applied in f32 and the
    activation is downcast back to the compute dtype before the next matmul.
    """
    x = x_ref[...]
    cdt = x.dtype

    # Hoist bias loads once per tile (JAX does not CSE broadcast_in_dim).
    b1 = b1_ref[...].astype(jnp.float32)
    b2 = b2_ref[...].astype(jnp.float32)
    b3 = b3_ref[...].astype(jnp.float32)
    b4 = b4_ref[...].astype(jnp.float32)

    h = jnp.dot(x, w1_ref[...], preferred_element_type=jnp.float32)
    h = jnp.maximum(h + b1, 0.0).astype(cdt)
    h = jnp.dot(h, w2_ref[...], preferred_element_type=jnp.float32)
    h = jnp.maximum(h + b2, 0.0).astype(cdt)
    h = jnp.dot(h, w3_ref[...], preferred_element_type=jnp.float32)
    h = jnp.maximum(h + b3, 0.0).astype(cdt)
    out = jnp.dot(h, w4_ref[...], preferred_element_type=jnp.float32) + b4

    out_ref[...] = out.astype(out_ref.dtype)


def init_rec_block_params(key, dim):
    """Deterministic synthetic parameters for `to_out` (Linear stack), f32."""
    d2, d4 = dim // 2, dim // 4
    dims = [(dim, d2), (d2, d4), (d4, d2), (d2, dim)]
    params = []
    keys = jax.random.split(key, len(dims))
    for k, (din, dout) in zip(keys, dims):
        kw, kb = jax.random.split(k)
        bound = 1.0 / jnp.sqrt(din)
        w = jax.random.uniform(kw, (din, dout), jnp.float32, -bound, bound)
        b = jax.random.uniform(kb, (1, dout), jnp.float32, -bound, bound)
        params.append((w, b))
    return params


def _vmem_cap_bytes():
    """~85% of the physical VMEM of the current generation (v7x: 64 MiB)."""
    try:
        info = pltpu.get_tpu_info()
        phys = int(getattr(info, "vmem_capacity_bytes", 64 << 20))
    except Exception:
        phys = 64 << 20  # conservative (v7x) fallback
    return int(0.85 * phys)


@functools.partial(jax.jit,
                   static_argnames=("tile_m", "compute_dtype", "out_dtype"))
def rec_block_forward(x, params, tile_m=None,
                      compute_dtype=jnp.bfloat16, out_dtype=None):
    """x: [B, L, D]. Returns out_1: [B, L, D] (matches the PyTorch forward)."""
    B, L, D = x.shape
    N = B * L
    d2, d4 = D // 2, D // 4
    out_dtype = x.dtype if out_dtype is None else out_dtype
    cbytes = jnp.dtype(compute_dtype).itemsize
    obytes = jnp.dtype(out_dtype).itemsize

    # ---- bf16 data path -----------------------------------------------------
    x2 = x.reshape(N, D).astype(compute_dtype)
    (w1, b1), (w2, b2), (w3, b3), (w4, b4) = params
    w1, w2, w3, w4 = (w.astype(compute_dtype) for w in (w1, w2, w3, w4))
    # Biases stay f32 (tiny; added after the f32 accumulation).

    weight_bytes = (sum(int(w.size) * w.dtype.itemsize for w in (w1, w2, w3, w4))
                    + sum(int(b.size) * b.dtype.itemsize for b in (b1, b2, b3, b4)))

    # ---- Row tiling -----------------------------------------------------------
    if tile_m is None:
        # ~1 MiB input tile in the compute dtype, clamped to [512, 2048] rows —
        # amortizes the ~0.35 us per-grid-step overhead on v6e/v7x.
        tile_m = int(min(2048, max(512, (1 << 20) // max(1, D * cbytes))))
    tm = max(8, min(int(tile_m), ((N + 7) // 8) * 8))
    tm = (tm // 8) * 8

    # v7x has 2 TensorCores: make sure the "parallel" grid axis has >= 2 steps
    # whenever there is enough work to split (free on v5e/v6e).
    if pl.cdiv(N, tm) < 2 and N > 8:
        tm = max(8, 8 * pl.cdiv(N, 16))

    # ---- VMEM guard -----------------------------------------------------------
    cap = _vmem_cap_bytes()

    def footprint(t):
        return (2 * t * D * cbytes        # x tiles (double buffered)
                + 2 * t * D * obytes      # out tiles (double buffered)
                + 2 * weight_bytes        # resident weights (double buffered)
                + t * (D + d2 + d4) * 4   # f32 intermediates
                + (2 << 20))              # Mosaic internal-scratch headroom

    while tm > 8 and footprint(tm) > cap:
        tm = max(8, ((tm // 2) // 8) * 8)
    # TODO(synk): if weights alone ever exceed the cap (very large D), split the
    # MLP into two pallas_calls (layers 1-2 / 3-4) so each call only keeps its
    # own weights resident; not needed at these sizes.
    # TODO(synk): grid-invariant weight specs could be single-buffered via
    # pipeline_mode=pl.Buffered(1) to reclaim one weight copy of VMEM on v7x.

    if tm >= N:
        tm = N  # single full-extent block (allowed even when N % 8 != 0)
    grid = (pl.cdiv(N, tm),)  # ragged last tile handled by Pallas (no pad/slice)

    fp = footprint(tm)
    vmem_limit = int(min(int(1.25 * fp), cap)) if fp > (32 << 20) else None

    # ---- Cost estimate (advisory, helps XLA schedule around the call) --------
    flops = 2 * N * (D * d2 + d2 * d4 + d4 * d2 + d2 * D)
    bytes_accessed = N * D * (cbytes + obytes) + weight_bytes
    cost = pl.CostEstimate(flops=int(flops), transcendentals=0,
                           bytes_accessed=int(bytes_accessed))

    full = lambda arr: pl.BlockSpec(arr.shape, lambda i: (0, 0))
    # TODO(synk): if D < 128 is a real production case, pack the feature axis
    # to 128 lanes in the wrapper to avoid masked vst partial stores.

    out2 = pl.pallas_call(
        _rec_block_kernel,
        out_shape=jax.ShapeDtypeStruct((N, D), out_dtype),
        grid_spec=pltpu.PrefetchScalarGridSpec(
            num_scalar_prefetch=0,
            grid=grid,
            in_specs=[
                pl.BlockSpec((tm, D), lambda i: (i, 0)),   # x rows
                full(w1), full(b1),
                full(w2), full(b2),
                full(w3), full(b3),
                full(w4), full(b4),
            ],
            out_specs=pl.BlockSpec((tm, D), lambda i: (i, 0)),  # out_1 rows
        ),
        compiler_params=pltpu.CompilerParams(
            dimension_semantics=("parallel",),
            vmem_limit_bytes=vmem_limit),
        cost_estimate=cost,
    )(x2, w1, b1, w2, b2, w3, b3, w4, b4)

    # rec_score / quantile: debug-only in the PyTorch module, not returned.
    return out2.reshape(B, L, D)


def _reference_forward(x, params):
    """Pure-JAX f32 reference of to_out(x)."""
    h = x
    for i, (w, b) in enumerate(params):
        h = h @ w + b[0]
        if i < len(params) - 1:
            h = jnp.maximum(h, 0.0)
    return h


def _quantized_reference(x, params, dt=jnp.bfloat16):
    """Reference with bf16-rounded x / weights (matches the kernel's inputs)."""
    xq = x.astype(dt).astype(jnp.float32)
    pq = [(w.astype(dt).astype(jnp.float32), b) for (w, b) in params]
    return _reference_forward(xq, pq)


if __name__ == "__main__":
    key = jax.random.PRNGKey(0)
    k1, k2, k3, k4 = jax.random.split(key, 4)

    # Case 1: lane-dense feature dim; grid is split into >= 2 row tiles.
    B, L, D = 2, 16, 128
    x = jax.random.normal(k1, (B, L, D), jnp.float32)
    params = init_rec_block_params(k2, D)
    out = jax.block_until_ready(rec_block_forward(x, params))
    ref = _quantized_reference(x, params)
    assert out.shape == (B, L, D) and out.dtype == x.dtype
    assert jnp.allclose(out, ref, atol=3e-2, rtol=3e-2), \
        float(jnp.max(jnp.abs(out - ref)))

    # Case 2: small D and a ragged row count (N=30 -> masked last row tile).
    B2, L2, D2 = 3, 10, 32
    xb = jax.random.normal(k3, (B2, L2, D2), jnp.float32)
    params2 = init_rec_block_params(k4, D2)
    out_b = jax.block_until_ready(rec_block_forward(xb, params2))
    ref_b = _quantized_reference(xb, params2)
    assert out_b.shape == (B2, L2, D2)
    assert jnp.allclose(out_b, ref_b, atol=3e-2, rtol=3e-2), \
        float(jnp.max(jnp.abs(out_b - ref_b)))

    print("KERNEL_OK")
</pallas_src>

<mosaic_0001>
module attributes {stable_mosaic.version = 11 : i64} {
  func.func @_rec_block_kernel(%arg0: i32, %arg1: memref<16x128xbf16, #tpu.memory_space<vmem>>, %arg2: memref<128x64xbf16, #tpu.memory_space<vmem>>, %arg3: memref<1x64xf32, #tpu.memory_space<vmem>>, %arg4: memref<64x32xbf16, #tpu.memory_space<vmem>>, %arg5: memref<1x32xf32, #tpu.memory_space<vmem>>, %arg6: memref<32x64xbf16, #tpu.memory_space<vmem>>, %arg7: memref<1x64xf32, #tpu.memory_space<vmem>>, %arg8: memref<64x128xbf16, #tpu.memory_space<vmem>>, %arg9: memref<1x128xf32, #tpu.memory_space<vmem>>, %arg10: memref<16x128xf32, #tpu.memory_space<vmem>>) attributes {dimension_semantics = [#tpu.dimension_semantics<parallel>], iteration_bounds = array<i64: 2>, scalar_prefetch = 0 : i64, scratch_operands = 0 : i64, tpu.core_type = #tpu.core_type<tc>, window_params = [{transform_indices = @transform_0, window_bounds = array<i64: 16, 128>}, {pipeline_mode = #tpu.pipeline_mode<synchronous>, transform_indices = @transform_1, window_bounds = array<i64: 128, 64>}, {pipeline_mode = #tpu.pipeline_mode<synchronous>, transform_indices = @transform_2, window_bounds = array<i64: 1, 64>}, {pipeline_mode = #tpu.pipeline_mode<synchronous>, transform_indices = @transform_3, window_bounds = array<i64: 64, 32>}, {pipeline_mode = #tpu.pipeline_mode<synchronous>, transform_indices = @transform_4, window_bounds = array<i64: 1, 32>}, {pipeline_mode = #tpu.pipeline_mode<synchronous>, transform_indices = @transform_5, window_bounds = array<i64: 32, 64>}, {pipeline_mode = #tpu.pipeline_mode<synchronous>, transform_indices = @transform_6, window_bounds = array<i64: 1, 64>}, {pipeline_mode = #tpu.pipeline_mode<synchronous>, transform_indices = @transform_7, window_bounds = array<i64: 64, 128>}, {pipeline_mode = #tpu.pipeline_mode<synchronous>, transform_indices = @transform_8, window_bounds = array<i64: 1, 128>}, {transform_indices = @transform_9, window_bounds = array<i64: 16, 128>}]} {
    %c0 = arith.constant 0 : index
    %c0_0 = arith.constant 0 : index
    %0 = vector.load %arg1[%c0, %c0_0] : memref<16x128xbf16, #tpu.memory_space<vmem>>, vector<16x128xbf16>
    %c0_1 = arith.constant 0 : index
    %c0_2 = arith.constant 0 : index
    %1 = vector.load %arg3[%c0_1, %c0_2] : memref<1x64xf32, #tpu.memory_space<vmem>>, vector<1x64xf32>
    %c0_3 = arith.constant 0 : index
    %c0_4 = arith.constant 0 : index
    %2 = vector.load %arg5[%c0_3, %c0_4] : memref<1x32xf32, #tpu.memory_space<vmem>>, vector<1x32xf32>
    %c0_5 = arith.constant 0 : index
    %c0_6 = arith.constant 0 : index
    %3 = vector.load %arg7[%c0_5, %c0_6] : memref<1x64xf32, #tpu.memory_space<vmem>>, vector<1x64xf32>
    %c0_7 = arith.constant 0 : index
    %c0_8 = arith.constant 0 : index
    %4 = vector.load %arg9[%c0_7, %c0_8] : memref<1x128xf32, #tpu.memory_space<vmem>>, vector<1x128xf32>
    %c0_9 = arith.constant 0 : index
    %c0_10 = arith.constant 0 : index
    %5 = vector.load %arg2[%c0_9, %c0_10] : memref<128x64xbf16, #tpu.memory_space<vmem>>, vector<128x64xbf16>
    %cst = arith.constant dense<0.000000e+00> : vector<16x64xf32>
    %6 = tpu.matmul %0, %5, %cst {dimension_numbers = #tpu.dot_dimension_numbers<[1], [0], [0], [1], [0, 0, 1, 1], [], []>} : vector<16x128xbf16>, vector<128x64xbf16>, vector<16x64xf32> -> vector<16x64xf32>
    %7 = vector.broadcast %1 : vector<1x64xf32> to vector<16x64xf32>
    %8 = arith.addf %6, %7 : vector<16x64xf32>
    %cst_11 = arith.constant 0.000000e+00 : f32
    %9 = vector.broadcast %cst_11 : f32 to vector<16x64xf32>
    %10 = arith.maximumf %8, %9 : vector<16x64xf32>
    %11 = arith.truncf %10 : vector<16x64xf32> to vector<16x64xbf16>
    %c0_12 = arith.constant 0 : index
    %c0_13 = arith.constant 0 : index
    %12 = vector.load %arg4[%c0_12, %c0_13] : memref<64x32xbf16, #tpu.memory_space<vmem>>, vector<64x32xbf16>
    %cst_14 = arith.constant dense<0.000000e+00> : vector<16x32xf32>
    %13 = tpu.matmul %11, %12, %cst_14 {dimension_numbers = #tpu.dot_dimension_numbers<[1], [0], [0], [1], [0, 0, 1, 1], [], []>} : vector<16x64xbf16>, vector<64x32xbf16>, vector<16x32xf32> -> vector<16x32xf32>
    %14 = vector.broadcast %2 : vector<1x32xf32> to vector<16x32xf32>
    %15 = arith.addf %13, %14 : vector<16x32xf32>
    %cst_15 = arith.constant 0.000000e+00 : f32
    %16 = vector.broadcast %cst_15 : f32 to vector<16x32xf32>
    %17 = arith.maximumf %15, %16 : vector<16x32xf32>
    %18 = arith.truncf %17 : vector<16x32xf32> to vector<16x32xbf16>
    %c0_16 = arith.constant 0 : index
    %c0_17 = arith.constant 0 : index
    %19 = vector.load %arg6[%c0_16, %c0_17] : memref<32x64xbf16, #tpu.memory_space<vmem>>, vector<32x64xbf16>
    %cst_18 = arith.constant dense<0.000000e+00> : vector<16x64xf32>
    %20 = tpu.matmul %18, %19, %cst_18 {dimension_numbers = #tpu.dot_dimension_numbers<[1], [0], [0], [1], [0, 0, 1, 1], [], []>} : vector<16x32xbf16>, vector<32x64xbf16>, vector<16x64xf32> -> vector<16x64xf32>
    %21 = vector.broadcast %3 : vector<1x64xf32> to vector<16x64xf32>
    %22 = arith.addf %20, %21 : vector<16x64xf32>
    %cst_19 = arith.constant 0.000000e+00 : f32
    %23 = vector.broadcast %cst_19 : f32 to vector<16x64xf32>
    %24 = arith.maximumf %22, %23 : vector<16x64xf32>
    %25 = arith.truncf %24 : vector<16x64xf32> to vector<16x64xbf16>
    %c0_20 = arith.constant 0 : index
    %c0_21 = arith.constant 0 : index
    %26 = vector.load %arg8[%c0_20, %c0_21] : memref<64x128xbf16, #tpu.memory_space<vmem>>, vector<64x128xbf16>
    %cst_22 = arith.constant dense<0.000000e+00> : vector<16x128xf32>
    %27 = tpu.matmul %25, %26, %cst_22 {dimension_numbers = #tpu.dot_dimension_numbers<[1], [0], [0], [1], [0, 0, 1, 1], [], []>} : vector<16x64xbf16>, vector<64x128xbf16>, vector<16x128xf32> -> vector<16x128xf32>
    %28 = vector.broadcast %4 : vector<1x128xf32> to vector<16x128xf32>
    %29 = arith.addf %27, %28 : vector<16x128xf32>
    %c0_23 = arith.constant 0 : index
    %c0_24 = arith.constant 0 : index
    %30 = vector.load %arg10[%c0_23, %c0_24] : memref<16x128xf32, #tpu.memory_space<vmem>>, vector<16x128xf32>
    tpu.vector_store %arg10[%c0_23, %c0_24], %29 {strides = array<i32>} : memref<16x128xf32, #tpu.memory_space<vmem>>, vector<16x128xf32>,
    return
  }
  func.func @transform_0(%arg0: i32) -> (i32, i32) {
    %c0_i32 = arith.constant 0 : i32
    %c0_i32_0 = arith.constant 0 : i32
    return %arg0, %c0_i32 : i32, i32
  }
  func.func @transform_1(%arg0: i32) -> (i32, i32) {
    %c0_i32 = arith.constant 0 : i32
    %c0_i32_0 = arith.constant 0 : i32
    %c0_i32_1 = arith.constant 0 : i32
    return %c0_i32, %c0_i32_0 : i32, i32
  }
  func.func @transform_2(%arg0: i32) -> (i32, i32) {
    %c0_i32 = arith.constant 0 : i32
    %c0_i32_0 = arith.constant 0 : i32
    %c0_i32_1 = arith.constant 0 : i32
    return %c0_i32, %c0_i32_0 : i32, i32
  }
  func.func @transform_3(%arg0: i32) -> (i32, i32) {
    %c0_i32 = arith.constant 0 : i32
    %c0_i32_0 = arith.constant 0 : i32
    %c0_i32_1 = arith.constant 0 : i32
    return %c0_i32, %c0_i32_0 : i32, i32
  }
  func.func @transform_4(%arg0: i32) -> (i32, i32) {
    %c0_i32 = arith.constant 0 : i32
    %c0_i32_0 = arith.constant 0 : i32
    %c0_i32_1 = arith.constant 0 : i32
    return %c0_i32, %c0_i32_0 : i32, i32
  }
  func.func @transform_5(%arg0: i32) -> (i32, i32) {
    %c0_i32 = arith.constant 0 : i32
    %c0_i32_0 = arith.constant 0 : i32
    %c0_i32_1 = arith.constant 0 : i32
    return %c0_i32, %c0_i32_0 : i32, i32
  }
  func.func @transform_6(%arg0: i32) -> (i32, i32) {
    %c0_i32 = arith.constant 0 : i32
    %c0_i32_0 = arith.constant 0 : i32
    %c0_i32_1 = arith.constant 0 : i32
    return %c0_i32, %c0_i32_0 : i32, i32
  }
  func.func @transform_7(%arg0: i32) -> (i32, i32) {
    %c0_i32 = arith.constant 0 : i32
    %c0_i32_0 = arith.constant 0 : i32
    %c0_i32_1 = arith.constant 0 : i32
    return %c0_i32, %c0_i32_0 : i32, i32
  }
  func.func @transform_8(%arg0: i32) -> (i32, i32) {
    %c0_i32 = arith.constant 0 : i32
    %c0_i32_0 = arith.constant 0 : i32
    %c0_i32_1 = arith.constant 0 : i32
    return %c0_i32, %c0_i32_0 : i32, i32
  }
  func.func @transform_9(%arg0: i32) -> (i32, i32) {
    %c0_i32 = arith.constant 0 : i32
    %c0_i32_0 = arith.constant 0 : i32
    return %arg0, %c0_i32 : i32, i32
  }
}

</mosaic_0001>

<bundles_post_ra>
// kernel: rec_block_forward.1
= control target key start
LH: loop header
LB: loop body
LE: loop exit
PB: predicated region body
PF: predicated region fallthrough
CT: control target
= control target key end

     0   :  { %14 = vsyncpa [#allocation3], 0  ;;  %s1083_s0 = inlined_call_operand.vmem [shape: bf16[32,128], index: 0, kind: input, shape index: {}]   ;;  %s1084_s1 = inlined_call_operand.vmem [shape: bf16[128,64], index: 1, kind: input, shape index: {}]   ;;  %s1085_s2 = inlined_call_operand.vmem [shape: f32[1,64], index: 2, kind: input, shape index: {}]   ;;  %s1086_s3 = inlined_call_operand.vmem [shape: bf16[64,32], index: 3, kind: input, shape index: {}]   ;;  %s1087_s4 = inlined_call_operand.vmem [shape: f32[1,32], index: 4, kind: input, shape index: {}]   ;;  %s1088_s5 = inlined_call_operand.vmem [shape: bf16[32,64], index: 5, kind: input, shape index: {}]   ;;  %s1089_s6 = inlined_call_operand.vmem [shape: f32[1,64], index: 6, kind: input, shape index: {}]   ;;  %s1090_s7 = inlined_call_operand.vmem [shape: bf16[64,128], index: 7, kind: input, shape index: {}]   ;;  %s1091_s8 = inlined_call_operand.vmem [shape: f32[1,128], index: 8, kind: input, shape index: {}]   ;;  %s1092_s9 = inlined_call_operand.hbm [shape: f32[32,128], index: 9, kind: output, shape index: {}]  }
   0x1   :  { %16 = vsyncpa [#allocation3 + $0x1], 0  ;;  %s931_s30 = smov 0   ;;  %s933_s10 = smov 0  }
   0x2   :  { %s935_s11 = smov 0   ;;  %s937_s12 = smov 0  }
   0x3 LB: > { %s952_s13 = sadd.s32 4294967295, %s877_s12   ;;  %s659_s14 = sadd.s32 4294967294, %s877_s12   ;;  %s877_s12 = sphi %s937_s12, %s1098_s12   ;;  %s873_s11 = sphi %s935_s11, %s1097_s11   ;;  %s869_s10 = sphi %s933_s10, %s1096_s10   ;;  %s865_s30 = sphi %s931_s30, %s1095_s30  }
   0x4   : > { %s956_s15 = sadd.s32 1, %s877_s12   ;;  %s223_s16 = sadd.s32 1, %s873_s11 }
   0x5   : > { %s220_s17 = ssub.s32 %s877_s12, %s956_s15  ;;  %p233_p0 = scmp.ne.s32.totalorder %s873_s11, %s869_s10 }
   0x6   : > { %p221_p1 = scmp.eq.s32.totalorder %s220_s17, 0  ;;  %p234_p2 = scmp.eq.s32.totalorder %s952_s13, 1 }
   0x7   : > { %p239_p3 = scmp.ne.s32.totalorder %s869_s10, %s865_s30  ;;  %p240_p4 = scmp.eq.s32.totalorder %s659_s14, 1 }
   0x8   : > { %s967_s18 = scalar_select %p221_p1, %s873_s11, %s223_s16  }
   0x9   : > { %p969_p5 = por %p234_p2, %p233_p0  ;;  %p973_p6 = por %p240_p4, %p239_p3 }
   0xa   : > { %p662_p7 = scmp.ge.s32.totalorder %s877_s12, 1  ;;  %p291_p8 = scmp.lt.s32.totalorder %s877_s12, 3 }
   0xc   : > { %p292_p9 = pnand %p662_p7, %p291_p8 }
   0xd   : > { %s664_s29 = sshll.u32 (!%p292_p9), %s952_s13, 1  ;;  %s324_s21 = sand.u32 (!%p292_p9), 1, %s869_s10  }
   0xe   : > { %295 = sbr.rel (%p292_p9) target bundleno = 623 (0x26f), region = 56  ;;  %p328_p10 = scmp.lt.s32.totalorder (!%p292_p9), %s664_s29, 3 }
   0xf   : > { %s663_s22 = sshll.u32 (!%p292_p9), %s324_s21, 4  ;;  %s769_s25 = sshll.u32 (!%p292_p9), %s952_s13, 4 }
  0x10   : > { %s593_s27 = scalar_lea.hbm (!%p292_p9), %s1092_s9, %s769_s25  ;;  %s326_s28 = scalar_lea.vmem (!%p292_p9), [#allocation2], %s663_s22 }
  0x11   : > { %s596_s16 = sshll.u32 (!%p292_p9), %s593_s27, 4  ;;  %s582_s17 = scalar_lea.sflag (!%p292_p9), [#allocation3], %s324_s21  ;;  %s597_s16 = int_to_ptr.hbm [resolvable:$true] %s596_s16 }
  0x12   : > { %s835_s22 = scalar_lea.hbm (!%p292_p9), %s1092_s9, 32 }
  0x13   : > { %v758_v0 = vld [vmem:[%s1084_s1 + $0x38] sm:$0xff]  ;;  %v757_v1 = vld [vmem:[%s1084_s1 + $0x30] sm:$0xff]  ;;  %v756_v2 = vld [vmem:[%s1084_s1 + $0x28] sm:$0xff]  ;;  %s1100_s29 = smov (!%p328_p10, %s664_s29), 3  ;;  %vm466_vm0 = vcmask 523264   ;;  %vm506_vm1 = vcmask 261120  }
  0x14   : > { %414 = vmatpush.bf16.msra.mxu0 %v758_v0  ;;  %v755_v3 = vld [vmem:[%s1084_s1 + $0x20] sm:$0xff]  ;;  %v754_v4 = vld [vmem:[%s1084_s1 + $0x18] sm:$0xff]  ;;  %v753_v5 = vld [vmem:[%s1084_s1 + $0x10] sm:$0xff]  ;;  %s665_s24 = sshll.u32 %s1100_s29, 2  ;;  %s829_s29 = sshra.s32 %s597_s16, 4  ;;  %s830_s29 = int_to_ptr.hbm [resolvable:$true] %s829_s29 }
  0x15   : > { %v752_v6 = vld [vmem:[%s1084_s1 + $0x8] sm:$0xff]  ;;  %v751_v7 = vld [vmem:[%s1084_s1] sm:$0xff]  ;;  %s331_s14 = scalar_lea.vmem %s1083_s0, %s665_s24  ;;  %v762_v9 = vld [vmem:[%s1086_s3 + $0x18] sm:$0xff]  ;;  %s831_s13 = scalar_lea.hbm %s830_s29, 16 }
  0x16   : > { %v750_v8 = vld [vmem:[%s331_s14] sm:$0xff]  ;;  %474 = vmatpush.bf16.msra.mxu1 %v762_v9  ;;  %v761_v10 = vld [vmem:[%s1086_s3 + $0x10] sm:$0xff]  ;;  %v760_v11 = vld [vmem:[%s1086_s3 + $0x8] sm:$0xff]  ;;  %s594_s14 = sshll.u32 %s326_s28, 4  ;;  %p832_p11 = scmp.ne.s32.totalorder %s830_s29, %s831_s13  ;;  %s595_s14 = int_to_ptr.vmem [resolvable:$true] %s594_s14 }
  0x17   : > { %v759_v12 = vld [vmem:[%s1086_s3] sm:$0xff]  ;;  %v764_v21 = vld [vmem:[%s1088_s5 + $0x8] sm:$0xff]  ;;  %v768_v31 = vld [vmem:[%s1090_s7 + $0x18] sm:$0xff]  ;;  %p836_p0 = scmp.lt.s32.totalorder %s830_s29, %s1092_s9  ;;  %p837_p1 = scmp.lt.s32.totalorder %s835_s22, %s831_s13 }
  0x18   : > { %415 = vmatpush.bf16.msra.mxu0 %v757_v1  ;;  %v811_v14 = vld [vmem:[%s1085_s2] ss:$0 sm:$0xff]  ;;  %516 = vmatpush.bf16.msra.mxu2 %v764_v21  ;;  %v767_v32 = vld [vmem:[%s1090_s7 + $0x10] sm:$0xff]  ;;  %v766_v33 = vld [vmem:[%s1090_s7 + $0x8] sm:$0xff]  ;;  %p833_p12 = pnand %p832_p11, %p969_p5 }
  0x19   : > { %v763_v22 = vld [vmem:[%s1088_s5] sm:$0xff]  ;;  %569 = vmatpush.bf16.msra.mxu3 %v768_v31  ;;  %p838_p2 = por %p837_p1, %p836_p0 }
  0x1a   : > { %475 = vmatpush.bf16.msra.mxu1 %v761_v10  ;;  %v812_v24 = vld [vmem:[%s1087_s4] ss:$0 sm:$0xff]  ;;  %p834_p13 = pneg %p833_p12 }
  0x1b   : > { %v765_v34 = vld [vmem:[%s1090_s7] sm:$0xff] }
  0x1c   : > { %416 = vmatpush.bf16.msra.mxu0 %v756_v2  ;;  %517 = vmatpush.bf16.msra.mxu2 %v763_v22  ;;  %v813_v36 = vld [vmem:[%s1089_s6] ss:$0 sm:$0xff]  ;;  %p839_p3 = pnand %p838_p2, %p834_p13 }
  0x1d   : > { %570 = vmatpush.bf16.msra.mxu3 %v767_v32  ;;  %v814_v43 = vld [vmem:[%s1091_s8] ss:$0 sm:$0xff] }
  0x1e   : > { %476 = vmatpush.bf16.msra.mxu1 %v760_v11 }
  0x20   : > { %417 = vmatpush.bf16.msra.mxu0 %v755_v3 }
  0x21   : > { %571 = vmatpush.bf16.msra.mxu3 %v766_v33 }
  0x22   : > { %477 = vmatpush.bf16.msra.mxu1 %v759_v12 }
  0x24   : > { %418 = vmatpush.bf16.msra.mxu0 %v754_v4 }
  0x25   : > { %572 = vmatpush.bf16.msra.mxu3 %v765_v34 }
  0x28   : > { %419 = vmatpush.bf16.msra.mxu0 %v753_v5 }
  0x2c   : > { %420 = vmatpush.bf16.msra.mxu0 %v752_v6 }
  0x30   : > { %421 = vmatpush.bf16.msra.mxu0 %v751_v7 }
  0x33   : > { %422 = vmatmul.bf16.vlgmr.msra.gmra.mxu0 %v750_v8 }
  0xb0   : > { %v423_v13 = vpop.f32.mrf.mxu0 }
  0xb1   : > { %v424_v15 = vadd.f32 %v811_v14, %v423_v13 }
  0xb3   : > { %v428_v18 = vmax.f32 %v424_v15, 0.0 }
  0xb8   : > { %v425_v16 = vpop.f32.mrf.mxu0 }
  0xb9   : > { %v426_v17 = vadd.f32 %v811_v14, %v425_v16 }
  0xbb   : > { %v429_v19 = vmax.f32 %v426_v17, 0.0 }
  0xbd   : > { %v430_v20 = vpack.c.bf16 %v429_v19, %v428_v18 }
  0xbf   : > { %718 = vmatmul.msk.bf16.vlgmr.msra.gmra.mxu1 %vm466_vm0, %v430_v20 }
 0x13c   : > { %v479_v23 = vpop.f32.mrf.mxu1 }
 0x13d   : > { %v480_v25 = vadd.f32 %v812_v24, %v479_v23 }
 0x13f   : > { %v484_v28 = vmax.f32 %v480_v25, 0.0 }
 0x144   : > { %v481_v26 = vpop.f32.mrf.mxu1 }
 0x145   : > { %v482_v27 = vadd.f32 %v812_v24, %v481_v26 }
 0x147   : > { %v485_v29 = vmax.f32 %v482_v27, 0.0 }
 0x149   : > { %v486_v30 = vpack.c.bf16 %v485_v29, %v484_v28 }
 0x14b   : > { %727 = vmatmul.msk.bf16.vlgmr.msra.gmra.mxu2 %vm506_vm1, %v486_v30 }
 0x1ce   : > { %v519_v35 = vpop.f32.mrf.mxu2 }
 0x1cf   : > { %v520_v37 = vadd.f32 %v813_v36, %v519_v35 }
 0x1d1   : > { %v524_v40 = vmax.f32 %v520_v37, 0.0 }
 0x1d6   : > { %v521_v38 = vpop.f32.mrf.mxu2 }
 0x1d7   : > { %v522_v39 = vadd.f32 %v813_v36, %v521_v38 }
 0x1d9   : > { %v525_v41 = vmax.f32 %v522_v39, 0.0 }
 0x1db   : > { %v526_v42 = vpack.c.bf16 %v525_v41, %v524_v40 }
 0x1dd   : > { %744 = vmatmul.msk.bf16.vlgmr.msra.gmra.mxu3 %vm466_vm0, %v526_v42 }
 0x260   : > { %v574_v44 = vpop.f32.mrf.mxu3 }
 0x261   : > { %v575_v45 = vadd.f32 %v814_v43, %v574_v44 }
 0x263   : > { %579 = vst [vmem:[%s326_s28] sm:$0xff] %v575_v45 }
 0x268   : > { %v576_v46 = vpop.f32.mrf.mxu3 }
 0x269   : > { %v577_v47 = vadd.f32 %v814_v43, %v576_v46 }
 0x26b   : > { %580 = vst [vmem:[%s326_s28 + $0x8] sm:$0xff] %v577_v47 }
 0x26c   : > { %842 = shalt.err (!%p839_p3)
}
 0x26d   : > { %s879_s21 = smov 128   ;;  %s880_s27 = smov 8  }
 0x26e   : > { %770 = dma.vmem_to_hbm [thread:$0]  (%p969_p5), %s595_s14, 256, %s597_s16, %s582_s17, %s879_s21, %s879_s21, %s880_s27  }
 0x26f PF: > { %p776_p4 = scmp.ge.s32.totalorder %s877_s12, 2  ;;  %s611_s28 = sand.u32 1, %s865_s30  }
 0x270   : > { %s612_s23 = scalar_lea.sflag [#allocation3], %s611_s28 }
 0x271   : > { %p773_p7 = pnand %p776_p4, %p973_p6 }
 0x273   : > { %p774_p8 = pneg %p773_p7 }
 0x275   : > { %860 = dma.done.wait (%p774_p8), %s612_s23, 256  }
 0x276   : > { %862 = vsyncadd (%p774_p8), %s612_s23, 4294967040  ;;  %p19_p9 = scmp.ge.s32.totalorder %s956_s15, 4   ;;  %s1095_s30 = smov %s869_s10 }
 0x277   : > { %s1096_s10 = smov %s873_s11  ;;  %s1097_s11 = smov %s967_s18 }
 0x278   : > { %s1098_s12 = smov %s956_s15  ;;  %21 = sbr.rel (!%p19_p9) target bundleno = 3 (0x3), region = 91 }
 0x27d   :  { %618 = vsyncpa [#allocation3], 1 }
 0x27e   :  { %620 = vsyncpa [#allocation3 + $0x1], 1 }

</bundles_post_ra>
